<compile_context>
chip_gen: v7x
topology: tpu7x:2x2x1
jax: 0.10.0
libtpu: 0.0.40
codegen_flags: <defaults>
</compile_context>

<pallas_src>
import functools

import jax
import jax.numpy as jnp
from jax import lax
from jax.experimental import pallas as pl
from jax.experimental.pallas import tpu as pltpu


def _round_up(x, m):
    return ((x + m - 1) // m) * m


def _gaussian_smearing_kernel(dist_ref, offset_ref, out_ref, *, coeff, chunk):
    # dist_ref:   (1, TILE)  f32  distances, lane-dense
    # offset_ref: (G_pad, 1) f32  Gaussian centers (resident across the grid)
    # out_ref:    (TILE, G)       output rows: N on sublanes, G on lanes
    g = out_ref.shape[1]
    n_chunks = out_ref.shape[0] // chunk          # static; TILE % chunk == 0
    off = offset_ref[...]                         # (G_pad, 1)

    def body(c, carry):
        r0 = pl.multiple_of(c * chunk, chunk)
        d = dist_ref[:, pl.ds(r0, chunk)]         # (1, chunk)  lane-dense slice
        diff = d - off                            # (G_pad, chunk) broadcast both ways
        y = jnp.exp(coeff * diff * diff)          # EUP exp, full lane utilization
        # XLU transpose into the (rows, gaussians) store layout; hidden under the
        # much larger output DMA on this writeback-bound kernel.
        yt = jnp.transpose(y)                     # (chunk, G_pad)
        out_ref[pl.ds(r0, chunk), :] = yt[:, :g].astype(out_ref.dtype)
        return carry

    lax.fori_loop(0, n_chunks, body, 0)


def gaussian_smearing(dist, offset, coeff, *, tile_rows=16384, chunk_rows=512,
                      out_dtype=jnp.float32):
    """Forward of the PyTorch GaussianSmearing module.

    dist:   any shape (flattened to N distances), offset: (G,), coeff: python float.
    Returns (N, G) = exp(coeff * (dist.view(-1,1) - offset.view(1,-1))**2).
    Pass out_dtype=jnp.bfloat16 to halve the HBM writeback that bounds this
    kernel (accuracy drops to bf16; the f32 default matches PyTorch to 1e-5).
    """
    dist_flat = jnp.reshape(dist, (-1,)).astype(jnp.float32)
    n = int(dist_flat.shape[0])
    g = int(offset.shape[0])
    g_pad = _round_up(g, 8)          # sublane-align the on-core compute only;
                                     # the stored HBM output stays (N, g).

    # Row tiling: big tiles amortize per-grid-step overhead; the in-kernel loop
    # works `chunk` rows at a time to keep vreg pressure bounded.
    chunk = min(_round_up(chunk_rows, 8), max(8, _round_up(n, 8)))
    tile = min(_round_up(tile_rows, chunk), _round_up(n, chunk))
    grid = pl.cdiv(n, tile)
    if grid == 1 and tile >= 2 * chunk:          # v7x: keep both TensorCores busy
        tile = _round_up(pl.cdiv(tile, 2), chunk)
        grid = pl.cdiv(n, tile)
    n_in = grid * tile                           # only the (tiny) input is padded

    dist_row = jnp.pad(dist_flat, (0, n_in - n)).reshape(1, n_in)
    offset_col = jnp.pad(offset.astype(jnp.float32), (0, g_pad - g)).reshape(g_pad, 1)

    kernel = functools.partial(_gaussian_smearing_kernel,
                               coeff=float(coeff), chunk=chunk)

    # Double-buffered output tiles dominate VMEM; stay well under v7x's 64 MiB
    # physical VMEM while overriding v5e's 16 MiB default scoped limit.
    out_block_bytes = tile * g * jnp.dtype(out_dtype).itemsize
    vmem_limit = int(min(56 << 20, max(24 << 20, 3 * out_block_bytes + (8 << 20))))

    return pl.pallas_call(
        kernel,
        out_shape=jax.ShapeDtypeStruct((n, g), out_dtype),
        grid_spec=pltpu.PrefetchScalarGridSpec(
            num_scalar_prefetch=0,
            grid=(grid,),
            in_specs=[
                pl.BlockSpec((1, tile), lambda i: (0, i)),     # distance row tile
                pl.BlockSpec((g_pad, 1), lambda i: (0, 0)),    # offsets (resident)
            ],
            out_specs=pl.BlockSpec((tile, g), lambda i: (i, 0)),  # (N, G) directly
        ),
        compiler_params=pltpu.CompilerParams(
            dimension_semantics=("parallel",),                 # shard row tiles (v7x)
            vmem_limit_bytes=vmem_limit,
        ),
    )(dist_row, offset_col)


def gaussian_smearing_ref(dist, offset, coeff):
    d = (jnp.reshape(dist, (-1, 1)).astype(jnp.float32)
         - jnp.reshape(offset, (1, -1)).astype(jnp.float32))
    return jnp.exp(coeff * d * d)


if __name__ == "__main__":
    # Module parameters (deterministic, as in __init__).
    start, stop, num_gaussians = 0.0, 5.0, 50
    offset = jnp.linspace(start, stop, num_gaussians, dtype=jnp.float32)
    coeff = -0.5 / float(offset[1] - offset[0]) ** 2

    # Small deterministic input: 2 graphs with 64 edges each -> 128 distances.
    key = jax.random.PRNGKey(0)
    dist = jax.random.uniform(key, (2, 64), minval=0.0, maxval=5.0,
                              dtype=jnp.float32)

    out = gaussian_smearing(dist, offset, coeff)
    out = jax.block_until_ready(out)

    ref = gaussian_smearing_ref(dist, offset, coeff)
    assert out.shape == (128, num_gaussians), out.shape
    assert jnp.allclose(out, ref, atol=1e-5, rtol=1e-5), "mismatch vs reference"

    print("KERNEL_OK")
</pallas_src>

<mosaic_0001>
module attributes {stable_mosaic.version = 11 : i64} {
  func.func @_gaussian_smearing_kernel(%arg0: i32, %arg1: memref<1x128xf32, #tpu.memory_space<vmem>>, %arg2: memref<56x1xf32, #tpu.memory_space<vmem>>, %arg3: memref<128x50xf32, #tpu.memory_space<vmem>>) attributes {dimension_semantics = [#tpu.dimension_semantics<parallel>], iteration_bounds = array<i64: 1>, scalar_prefetch = 0 : i64, scratch_operands = 0 : i64, tpu.core_type = #tpu.core_type<tc>, window_params = [{transform_indices = @transform_0, window_bounds = array<i64: 1, 128>}, {pipeline_mode = #tpu.pipeline_mode<synchronous>, transform_indices = @transform_1, window_bounds = array<i64: 56, 1>}, {transform_indices = @transform_2, window_bounds = array<i64: 128, 50>}]} {
    %c0 = arith.constant 0 : index
    %c0_0 = arith.constant 0 : index
    %0 = vector.load %arg2[%c0, %c0_0] : memref<56x1xf32, #tpu.memory_space<vmem>>, vector<56x1xf32>
    %c0_i32 = arith.constant 0 : i32
    %c128_i32 = arith.constant 128 : i32
    %1 = arith.muli %c0_i32, %c128_i32 : i32
    %2 = tpu.assume_multiple %1, 128 : i32
    %c0_1 = arith.constant 0 : index
    %3 = arith.index_cast %2 : i32 to index
    %4 = vector.load %arg1[%c0_1, %3] : memref<1x128xf32, #tpu.memory_space<vmem>>, vector<1x128xf32>
    %5 = vector.broadcast %4 : vector<1x128xf32> to vector<56x128xf32>
    %6 = vector.broadcast %0 : vector<56x1xf32> to vector<56x128xf32>
    %7 = arith.subf %5, %6 : vector<56x128xf32>
    %cst = arith.constant -48.0200043 : f32
    %8 = vector.broadcast %cst : f32 to vector<56x128xf32>
    %9 = arith.mulf %8, %7 : vector<56x128xf32>
    %10 = arith.mulf %9, %7 : vector<56x128xf32>
    %11 = math.exp %10 : vector<56x128xf32>
    %12 = tpu.transpose %11, [1, 0] : vector<56x128xf32> -> vector<128x56xf32>
    %13 = vector.extract_strided_slice %12 {offsets = [0, 0], sizes = [128, 50], strides = [1, 1]} : vector<128x56xf32> to vector<128x50xf32>
    %14 = arith.index_cast %2 : i32 to index
    %c0_2 = arith.constant 0 : index
    %15 = vector.load %arg3[%14, %c0_2] : memref<128x50xf32, #tpu.memory_space<vmem>>, vector<128x50xf32>
    tpu.vector_store %arg3[%14, %c0_2], %13 {strides = array<i32>} : memref<128x50xf32, #tpu.memory_space<vmem>>, vector<128x50xf32>,
    %c1_i32 = arith.constant 1 : i32
    return
  }
  func.func @transform_0(%arg0: i32) -> (i32, i32) {
    %c0_i32 = arith.constant 0 : i32
    %c0_i32_0 = arith.constant 0 : i32
    return %c0_i32, %arg0 : i32, i32
  }
  func.func @transform_1(%arg0: i32) -> (i32, i32) {
    %c0_i32 = arith.constant 0 : i32
    %c0_i32_0 = arith.constant 0 : i32
    %c0_i32_1 = arith.constant 0 : i32
    return %c0_i32, %c0_i32_0 : i32, i32
  }
  func.func @transform_2(%arg0: i32) -> (i32, i32) {
    %c0_i32 = arith.constant 0 : i32
    %c0_i32_0 = arith.constant 0 : i32
    return %arg0, %c0_i32 : i32, i32
  }
}

</mosaic_0001>

<bundles_post_ra>
// kernel: tpu_custom_call.1
= control target key start
LH: loop header
LB: loop body
LE: loop exit
PB: predicated region body
PF: predicated region fallthrough
CT: control target
= control target key end

     0   :  { %v167_v0 = vmov 0   ;;  %vm127_vm0 = vcmask 408576   ;;  %s271_s1 = inlined_call_operand.vmem [shape: f32[56,1], index: 1, kind: input, shape index: {}]   ;;  %s272_s0 = inlined_call_operand.vmem [shape: f32[1,128], index: 0, kind: input, shape index: {}]   ;;  %s273_s2 = inlined_call_operand.vmem [shape: f32[128,50], index: 2, kind: output, shape index: {}]  }
   0x1   :  { %152 = vset.pattern.permute.xlu1 %v167_v0  ;;  %151 = vset.pattern.permute.xlu0 %v167_v0  ;;  %v13_v1 = vld [vmem:[%s271_s1 + $0x10] sm:$0xff]  ;;  %v11_v2 = vld [vmem:[%s271_s1] sm:$0xff]  ;;  %v14_v3 = vld [vmem:[%s271_s1 + $0x18] sm:$0xff] }
   0x2   :  { %37 = vperm.xlu1 %152, %v13_v1   ;;  %27 = vperm.xlu0 %151, %v11_v2   ;;  %v12_v4 = vld [vmem:[%s271_s1 + $0x8] sm:$0xff]  ;;  %v15_v6 = vld [vmem:[%s271_s1 + $0x20] sm:$0xff]  ;;  %v17_v7 = vld [vmem:[%s271_s1 + $0x30] sm:$0xff] }
   0x3   :  { %v16_v5 = vld [vmem:[%s271_s1 + $0x28] sm:$0xff]  ;;  %v148_v8 = vld [vmem:[%s272_s0] ss:$0 sm:$0xff] }
   0x6   :  { %42 = vperm.xlu1 %152, %v14_v3   ;;  %32 = vperm.xlu0 %151, %v12_v4  }
   0xa   :  { %52 = vperm.xlu1 %152, %v16_v5   ;;  %47 = vperm.xlu0 %151, %v15_v6  }
   0xe   :  { %57 = vperm.xlu0 %151, %v17_v7  }
  0x81   :  { %v38_v9 = vpop.permute.xlu1 %37  ;;  %v28_v10 = vpop.permute.xlu0 %27 }
  0x82   :  { %v62_v11 = vsub.f32 %v148_v8, %v38_v9  ;;  %v60_v12 = vsub.f32 %v148_v8, %v28_v10 }
  0x84   :  { %v67_v13 = vmul.f32 -48.020004, %v60_v12  ;;  %v69_v15 = vmul.f32 -48.020004, %v62_v11 }
  0x85   :  { %v33_v14 = vpop.permute.xlu0 %32  ;;  %v43_v17 = vpop.permute.xlu1 %42 }
  0x86   :  { %v74_v16 = vmul.f32 %v67_v13, %v60_v12  ;;  %v61_v18 = vsub.f32 %v148_v8, %v33_v14  ;;  %v63_v19 = vsub.f32 %v148_v8, %v43_v17  ;;  %v76_v23 = vmul.f32 %v69_v15, %v62_v11 }
  0x88   :  { %v81_v20 = vmul.f32 1.442695, %v74_v16  ;;  %v68_v21 = vmul.f32 -48.020004, %v61_v18  ;;  %v70_v24 = vmul.f32 -48.020004, %v63_v19 }
  0x89   :  { %v48_v22 = vpop.permute.xlu0 %47  ;;  %v53_v27 = vpop.permute.xlu1 %52  ;;  %v85_v29 = vmul.f32 1.442695, %v76_v23 }
  0x8a   :  { %153 = vpow2.f32 %v81_v20  ;;  %v75_v25 = vmul.f32 %v68_v21, %v61_v18  ;;  %v64_v26 = vsub.f32 %v148_v8, %v48_v22  ;;  %v77_v30 = vmul.f32 %v70_v24, %v63_v19 }
  0x8b   :  { %v65_v31 = vsub.f32 %v148_v8, %v53_v27 }
  0x8c   :  { %v83_v28 = vmul.f32 1.442695, %v75_v25  ;;  %v71_v32 = vmul.f32 -48.020004, %v64_v26  ;;  %v87_v34 = vmul.f32 1.442695, %v77_v30 }
  0x8d   :  { %v58_v33 = vpop.permute.xlu0 %57  ;;  %v72_v35 = vmul.f32 -48.020004, %v65_v31 }
  0x8e   :  { %155 = vpow2.f32 %v83_v28  ;;  %v78_v36 = vmul.f32 %v71_v32, %v64_v26  ;;  %v66_v37 = vsub.f32 %v148_v8, %v58_v33 }
  0x8f   :  { %157 = vpow2.f32 %v85_v29  ;;  %v79_v39 = vmul.f32 %v72_v35, %v65_v31 }
  0x90   :  { %159 = vpow2.f32 %v87_v34  ;;  %v89_v40 = vmul.f32 1.442695, %v78_v36  ;;  %v73_v41 = vmul.f32 -48.020004, %v66_v37 }
  0x91   :  { %v91_v43 = vmul.f32 1.442695, %v79_v39 }
  0x92   :  { %161 = vpow2.f32 %v89_v40  ;;  %v80_v44 = vmul.f32 %v73_v41, %v66_v37 }
  0x93   :  { %163 = vpow2.f32 %v91_v43 }
  0x94   :  { %v154_v38 = vpop.eup %153  ;;  %v93_v46 = vmul.f32 1.442695, %v80_v44 }
  0x95   :  { %95 = vxpose.xlu1.b32.start [1/7] (short) %v154_v38, 128 }
  0x96   :  { %165 = vpow2.f32 %v93_v46 }
  0x98   :  { %v156_v42 = vpop.eup %155 }
  0x99   :  { %96 = vxpose.xlu1.b32.cont [2/7] (short) %v156_v42, 128  ;;  %v158_v45 = vpop.eup %157 }
  0x9a   :  { %v160_v47 = vpop.eup %159 }
  0x9c   :  { %v162_v48 = vpop.eup %161 }
  0x9d   :  { %97 = vxpose.xlu1.b32.cont [3/7] (short) %v158_v45, 128  ;;  %v164_v49 = vpop.eup %163 }
  0xa0   :  { %v166_v50 = vpop.eup %165 }
  0xa1   :  { %98 = vxpose.xlu1.b32.cont [4/7] (short) %v160_v47, 128 }
  0xa5   :  { %99 = vxpose.xlu1.b32.cont [5/7] (short) %v162_v48, 128 }
  0xa9   :  { %100 = vxpose.xlu1.b32.cont [6/7] (short) %v164_v49, 128 }
  0xad   :  { %101 = vxpose.xlu1.b32.end [7/7] (short) %v166_v50, 128 }
 0x115   :  { %v111_v51 = vpop.trf.xlu1 }
 0x116   :  { %128 = vst.msk [vmem:[%s273_s2] sm:$0xff] %vm127_vm0, %v111_v51 }
 0x119   :  { %v112_v52 = vpop.trf.xlu1 }
 0x11a   :  { %129 = vst.msk [vmem:[%s273_s2 + $0x8] sm:$0xff] %vm127_vm0, %v112_v52 }
 0x11d   :  { %v113_v53 = vpop.trf.xlu1 }
 0x11e   :  { %130 = vst.msk [vmem:[%s273_s2 + $0x10] sm:$0xff] %vm127_vm0, %v113_v53 }
 0x121   :  { %v114_v54 = vpop.trf.xlu1 }
 0x122   :  { %131 = vst.msk [vmem:[%s273_s2 + $0x18] sm:$0xff] %vm127_vm0, %v114_v54 }
 0x125   :  { %v115_v55 = vpop.trf.xlu1 }
 0x126   :  { %132 = vst.msk [vmem:[%s273_s2 + $0x20] sm:$0xff] %vm127_vm0, %v115_v55 }
 0x129   :  { %v116_v56 = vpop.trf.xlu1 }
 0x12a   :  { %133 = vst.msk [vmem:[%s273_s2 + $0x28] sm:$0xff] %vm127_vm0, %v116_v56 }
 0x12d   :  { %v117_v57 = vpop.trf.xlu1 }
 0x12e   :  { %134 = vst.msk [vmem:[%s273_s2 + $0x30] sm:$0xff] %vm127_vm0, %v117_v57 }
 0x131   :  { %v118_v58 = vpop.trf.xlu1 }
 0x132   :  { %135 = vst.msk [vmem:[%s273_s2 + $0x38] sm:$0xff] %vm127_vm0, %v118_v58 }
 0x135   :  { %v119_v59 = vpop.trf.xlu1 }
 0x136   :  { %136 = vst.msk [vmem:[%s273_s2 + $0x40] sm:$0xff] %vm127_vm0, %v119_v59 }
 0x139   :  { %v120_v60 = vpop.trf.xlu1 }
 0x13a   :  { %137 = vst.msk [vmem:[%s273_s2 + $0x48] sm:$0xff] %vm127_vm0, %v120_v60 }
 0x13d   :  { %v121_v61 = vpop.trf.xlu1 }
 0x13e   :  { %138 = vst.msk [vmem:[%s273_s2 + $0x50] sm:$0xff] %vm127_vm0, %v121_v61 }
 0x141   :  { %v122_v62 = vpop.trf.xlu1 }
 0x142   :  { %139 = vst.msk [vmem:[%s273_s2 + $0x58] sm:$0xff] %vm127_vm0, %v122_v62 }
 0x145   :  { %v123_v63 = vpop.trf.xlu1 }
 0x146   :  { %140 = vst.msk [vmem:[%s273_s2 + $0x60] sm:$0xff] %vm127_vm0, %v123_v63 }
 0x149   :  { %v124_v0 = vpop.trf.xlu1 }
 0x14a   :  { %141 = vst.msk [vmem:[%s273_s2 + $0x68] sm:$0xff] %vm127_vm0, %v124_v0 }
 0x14d   :  { %v125_v1 = vpop.trf.xlu1 }
 0x14e   :  { %142 = vst.msk [vmem:[%s273_s2 + $0x70] sm:$0xff] %vm127_vm0, %v125_v1 }
 0x151   :  { %v126_v2 = vpop.trf.xlu1 }
 0x152   :  { %143 = vst.msk [vmem:[%s273_s2 + $0x78] sm:$0xff] %vm127_vm0, %v126_v2 }

</bundles_post_ra>
